<compile_context>
chip_gen: v7x
topology: tpu7x:2x2x1
jax: 0.10.0
libtpu: 0.0.40
codegen_flags: <defaults>
</compile_context>

<pallas_src>
import functools

import jax
import jax.numpy as jnp
from jax import lax
from jax.experimental import pallas as pl
from jax.experimental.pallas import tpu as pltpu


def _block(shape):
    nd = len(shape)
    return pl.BlockSpec(shape, lambda i, _nd=nd: (0,) * _nd)


# --------------- Kernel 1: fused BN1d + Linear + BN1d + ReLU (one GEMM) ------
def _fc_bn_relu_kernel(x_ref, w_ref, b_ref, o_ref):
    y = jnp.dot(x_ref[...], w_ref[...], preferred_element_type=jnp.float32)
    o_ref[...] = jnp.maximum(y + b_ref[...], 0.0).astype(o_ref.dtype)


def _fc_bn_relu(x, w, b):
    B = x.shape[0]
    N = w.shape[1]
    return pl.pallas_call(
        _fc_bn_relu_kernel,
        out_shape=jax.ShapeDtypeStruct((B, N), x.dtype),
        grid_spec=pltpu.PrefetchScalarGridSpec(
            num_scalar_prefetch=0,
            grid=(1,),
            in_specs=[_block(x.shape), _block(w.shape), _block(b.shape)],
            out_specs=_block((B, N)),
        ),
        compiler_params=pltpu.CompilerParams(dimension_semantics=("arbitrary",)),
    )(x, w, b)


# ------ Kernel 2: two stride-1 ConvTranspose2d (+BN+ReLU) as GEMM + col2im ---
def _deconv_stack_kernel(x1_ref, w1_ref, b1_ref, w2_ref, b2_ref, o_ref,
                         s1_ref, s2_ref, *, batch):
    K = 3
    C1 = w1_ref.shape[1] // (K * K)      # 128
    C2 = w2_ref.shape[1] // (K * K)      # 64
    Hi, Wi = 3, 3                        # spatial input of deconv 1
    H1, W1 = Hi + K - 1, Wi + K - 1      # 5, 5

    # ConvTranspose2d(32->128, k3, s1) folded with BN1: one GEMM, then col2im.
    cols1 = jnp.dot(x1_ref[...], w1_ref[...], preferred_element_type=jnp.float32)
    s1_ref[...] = jnp.zeros(s1_ref.shape, s1_ref.dtype)
    for ky in range(K):
        for kx in range(K):
            t = ky * K + kx
            piece = cols1[:, t * C1:(t + 1) * C1].reshape(batch, Hi, Wi, C1)
            s1_ref[:, ky:ky + Hi, kx:kx + Wi, :] += piece
    h1 = jnp.maximum(s1_ref[...] + b1_ref[...], 0.0)          # (B, 5, 5, 128)

    # ConvTranspose2d(128->64, k3, s1) folded with BN2: one GEMM, then col2im.
    cols2 = jnp.dot(h1.reshape(batch * H1 * W1, C1), w2_ref[...],
                    preferred_element_type=jnp.float32)
    s2_ref[...] = jnp.zeros(s2_ref.shape, s2_ref.dtype)
    for ky in range(K):
        for kx in range(K):
            t = ky * K + kx
            piece = cols2[:, t * C2:(t + 1) * C2].reshape(batch, H1, W1, C2)
            s2_ref[:, ky:ky + H1, kx:kx + W1, :] += piece
    o_ref[...] = jnp.maximum(s2_ref[...] + b2_ref[...], 0.0).astype(o_ref.dtype)


def _deconv_stack(x1, w1, b1, w2, b2, batch):
    K = 3
    C1 = w1.shape[1] // (K * K)
    C2 = w2.shape[1] // (K * K)
    H2 = 7
    kernel = functools.partial(_deconv_stack_kernel, batch=batch)
    return pl.pallas_call(
        kernel,
        out_shape=jax.ShapeDtypeStruct((batch, H2, H2, C2), x1.dtype),
        grid_spec=pltpu.PrefetchScalarGridSpec(
            num_scalar_prefetch=0,
            grid=(1,),
            in_specs=[_block(x1.shape), _block(w1.shape), _block(b1.shape),
                      _block(w2.shape), _block(b2.shape)],
            out_specs=_block((batch, H2, H2, C2)),
            scratch_shapes=[pltpu.VMEM((batch, 5, 5, C1), jnp.float32),
                            pltpu.VMEM((batch, H2, H2, C2), jnp.float32)],
        ),
        compiler_params=pltpu.CompilerParams(dimension_semantics=("arbitrary",)),
    )(x1, w1, b1, w2, b2)


# ---- Kernel 3: stride-2 ConvTranspose2d == im2col conv on dilated input -----
def _final_conv_kernel(x_ref, w_ref, b_ref, o_ref, *, batch):
    K = 3
    _, Hp, Wp, Ci = x_ref.shape
    Ho, Wo = Hp - K + 1, Wp - K + 1
    x = x_ref[...]
    patches = []
    for ky in range(K):
        for kx in range(K):
            patches.append(x[:, ky:ky + Ho, kx:kx + Wo, :])
    pm = jnp.concatenate(patches, axis=-1)                    # (B, Ho, Wo, 9*Ci)
    pm = pm.reshape(batch * Ho * Wo, K * K * Ci)
    y = jnp.dot(pm, w_ref[...], preferred_element_type=jnp.float32) + b_ref[...]
    o_ref[...] = y.reshape(batch, Ho, Wo, -1).astype(o_ref.dtype)


def _final_conv(xd, w3, b3, batch, band):
    K = 3
    Ho = xd.shape[1] - K + 1
    kernel = functools.partial(_final_conv_kernel, batch=batch)
    return pl.pallas_call(
        kernel,
        out_shape=jax.ShapeDtypeStruct((batch, Ho, Ho, band), xd.dtype),
        grid_spec=pltpu.PrefetchScalarGridSpec(
            num_scalar_prefetch=0,
            grid=(1,),
            in_specs=[_block(xd.shape), _block(w3.shape), _block(b3.shape)],
            out_specs=_block((batch, Ho, Ho, band)),
        ),
        compiler_params=pltpu.CompilerParams(dimension_semantics=("arbitrary",)),
    )(xd, w3, b3)


# ----------------------------- full forward ----------------------------------
def decoder_forward(encode, params, band):
    (g0, be0, m0, v0,
     wfc, bfc, gF, beF, mF, vF,
     wt1, bt1, g1, be1, m1, v1,
     wt2, bt2, g2, be2, m2, v2,
     wt3, bt3) = params
    eps = 1e-5
    B = encode.shape[0]
    D = encode.shape[1]

    # Fold BN(in) + Linear + BN(fc) into a single affine map, and permute the
    # 288 outputs from (c, y, x) [NCHW view] to (y, x, c) [NHWC].
    s0 = g0 / jnp.sqrt(v0 + eps)
    t0 = be0 - m0 * s0
    sF = gF / jnp.sqrt(vF + eps)
    w_fc = (wfc.T * sF[None, :]) * s0[:, None]                # (D, 288)
    b_fc = (t0 @ wfc.T) * sF + bfc * sF + beF - mF * sF       # (288,)
    w_fc = w_fc.reshape(D, 32, 3, 3).transpose(0, 2, 3, 1).reshape(D, 288)
    b_fc = b_fc.reshape(32, 3, 3).transpose(1, 2, 0).reshape(1, 288)

    # Deconv1 (32->128, s=1) + BN folded: GEMM weight (Cin, K*K*Cout).
    s1 = g1 / jnp.sqrt(v1 + eps)
    w1m = jnp.transpose(wt1 * s1[None, :, None, None], (0, 2, 3, 1)).reshape(32, 9 * 128)
    b1f = (bt1 * s1 + be1 - m1 * s1).reshape(1, 128)

    # Deconv2 (128->64, s=1) + BN folded.
    s2 = g2 / jnp.sqrt(v2 + eps)
    w2m = jnp.transpose(wt2 * s2[None, :, None, None], (0, 2, 3, 1)).reshape(128, 9 * 64)
    b2f = (bt2 * s2 + be2 - m2 * s2).reshape(1, 64)

    # Deconv3 (64->band, s=2): forward conv on dilated input with flipped kernel.
    w3m = jnp.transpose(wt3[:, :, ::-1, ::-1], (2, 3, 0, 1)).reshape(9 * 64, band)
    b3f = bt3.reshape(1, band)

    # Run the three Pallas kernels; glue between them is pure layout.
    h0 = _fc_bn_relu(encode, w_fc, b_fc)                      # (B, 288), (y,x,c)
    x1 = h0.reshape(B * 9, 32)                                # rows = (b, y, x)
    h2 = _deconv_stack(x1, w1m, b1f, w2m, b2f, B)             # (B, 7, 7, 64) NHWC
    # zero-dilate (stride 2) + full pad (k-1 = 2)  ->  (B, 17, 17, 64)
    xd = jnp.zeros((B, 17, 17, 64), h2.dtype).at[:, 2:15:2, 2:15:2, :].set(h2)
    y = _final_conv(xd, w3m, b3f, B, band)                    # (B, 15, 15, band)
    return jnp.transpose(y, (0, 3, 1, 2))                     # NCHW like PyTorch


# ----------------------------- pure-JAX reference ----------------------------
def decoder_reference(encode, params, band):
    (g0, be0, m0, v0,
     wfc, bfc, gF, beF, mF, vF,
     wt1, bt1, g1, be1, m1, v1,
     wt2, bt2, g2, be2, m2, v2,
     wt3, bt3) = params
    eps = 1e-5

    def bn(x, g, b, m, v):
        shp = (1, -1) + (1,) * (x.ndim - 2)
        return ((x - m.reshape(shp)) / jnp.sqrt(v.reshape(shp) + eps)
                * g.reshape(shp) + b.reshape(shp))

    def convT(x, w, b, stride):
        K = w.shape[2]
        rhs = jnp.flip(w, (2, 3)).transpose(1, 0, 2, 3)       # (Co, Ci, K, K)
        o = lax.conv_general_dilated(
            x, rhs, window_strides=(1, 1),
            padding=[(K - 1, K - 1), (K - 1, K - 1)],
            lhs_dilation=(stride, stride),
            dimension_numbers=("NCHW", "OIHW", "NCHW"))
        return o + b.reshape(1, -1, 1, 1)

    x = bn(encode, g0, be0, m0, v0)
    y = jnp.maximum(bn(x @ wfc.T + bfc, gF, beF, mF, vF), 0.0)
    h = y.reshape(-1, 32, 3, 3)
    h = jnp.maximum(bn(convT(h, wt1, bt1, 1), g1, be1, m1, v1), 0.0)
    h = jnp.maximum(bn(convT(h, wt2, bt2, 1), g2, be2, m2, v2), 0.0)
    return convT(h, wt3, bt3, 2)


if __name__ == "__main__":
    B, D, band = 2, 16, 8
    key = jax.random.PRNGKey(0)
    ks = jax.random.split(key, 26)

    def nrm(k, shape, s=1.0):
        return s * jax.random.normal(k, shape, jnp.float32)

    def uni(k, shape):
        return jax.random.uniform(k, shape, jnp.float32, 0.5, 1.5)

    encode = nrm(ks[0], (B, D))

    params = (
        # BatchNorm1d(D)
        1.0 + 0.1 * nrm(ks[1], (D,)), 0.1 * nrm(ks[2], (D,)),
        0.1 * nrm(ks[3], (D,)), uni(ks[4], (D,)),
        # Linear(D, 288) + BatchNorm1d(288)
        nrm(ks[5], (288, D), 0.2), nrm(ks[6], (288,), 0.1),
        1.0 + 0.1 * nrm(ks[7], (288,)), 0.1 * nrm(ks[8], (288,)),
        0.1 * nrm(ks[9], (288,)), uni(ks[10], (288,)),
        # ConvTranspose2d(32, 128, 3, s=1) + BatchNorm2d(128)
        nrm(ks[11], (32, 128, 3, 3), 0.1), nrm(ks[12], (128,), 0.1),
        1.0 + 0.1 * nrm(ks[13], (128,)), 0.1 * nrm(ks[14], (128,)),
        0.1 * nrm(ks[15], (128,)), uni(ks[16], (128,)),
        # ConvTranspose2d(128, 64, 3, s=1) + BatchNorm2d(64)
        nrm(ks[17], (128, 64, 3, 3), 0.05), nrm(ks[18], (64,), 0.1),
        1.0 + 0.1 * nrm(ks[19], (64,)), 0.1 * nrm(ks[20], (64,)),
        0.1 * nrm(ks[21], (64,)), uni(ks[22], (64,)),
        # ConvTranspose2d(64, band, 3, s=2)
        nrm(ks[23], (64, band, 3, 3), 0.05), nrm(ks[24], (band,), 0.1),
    )

    out = decoder_forward(encode, params, band)
    out = jax.block_until_ready(out)
    ref = decoder_reference(encode, params, band)

    assert out.shape == (B, band, 15, 15), out.shape
    err = float(jnp.max(jnp.abs(out - ref)))
    assert jnp.allclose(out, ref, atol=2e-3, rtol=2e-3), err
    print("KERNEL_OK")
</pallas_src>

<mosaic_0001>
module attributes {stable_mosaic.version = 11 : i64} {
  func.func @_fc_bn_relu_kernel(%arg0: i32, %arg1: memref<2x16xf32, #tpu.memory_space<vmem>>, %arg2: memref<16x288xf32, #tpu.memory_space<vmem>>, %arg3: memref<1x288xf32, #tpu.memory_space<vmem>>, %arg4: memref<2x288xf32, #tpu.memory_space<vmem>>) attributes {dimension_semantics = [#tpu.dimension_semantics<arbitrary>], iteration_bounds = array<i64: 1>, scalar_prefetch = 0 : i64, scratch_operands = 0 : i64, tpu.core_type = #tpu.core_type<tc>, window_params = [{pipeline_mode = #tpu.pipeline_mode<synchronous>, transform_indices = @transform_0, window_bounds = array<i64: 2, 16>}, {pipeline_mode = #tpu.pipeline_mode<synchronous>, transform_indices = @transform_1, window_bounds = array<i64: 16, 288>}, {pipeline_mode = #tpu.pipeline_mode<synchronous>, transform_indices = @transform_2, window_bounds = array<i64: 1, 288>}, {pipeline_mode = #tpu.pipeline_mode<synchronous>, transform_indices = @transform_3, window_bounds = array<i64: 2, 288>}]} {
    %c0 = arith.constant 0 : index
    %c0_0 = arith.constant 0 : index
    %0 = vector.load %arg1[%c0, %c0_0] : memref<2x16xf32, #tpu.memory_space<vmem>>, vector<2x16xf32>
    %c0_1 = arith.constant 0 : index
    %c0_2 = arith.constant 0 : index
    %1 = vector.load %arg2[%c0_1, %c0_2] : memref<16x288xf32, #tpu.memory_space<vmem>>, vector<16x288xf32>
    %cst = arith.constant dense<0.000000e+00> : vector<2x288xf32>
    %2 = tpu.matmul %0, %1, %cst {dimension_numbers = #tpu.dot_dimension_numbers<[1], [0], [0], [1], [0, 0, 1, 1], [], []>} : vector<2x16xf32>, vector<16x288xf32>, vector<2x288xf32> -> vector<2x288xf32>
    %c0_3 = arith.constant 0 : index
    %c0_4 = arith.constant 0 : index
    %3 = vector.load %arg3[%c0_3, %c0_4] : memref<1x288xf32, #tpu.memory_space<vmem>>, vector<1x288xf32>
    %4 = vector.broadcast %3 : vector<1x288xf32> to vector<2x288xf32>
    %5 = arith.addf %2, %4 : vector<2x288xf32>
    %cst_5 = arith.constant 0.000000e+00 : f32
    %6 = vector.broadcast %cst_5 : f32 to vector<2x288xf32>
    %7 = arith.maximumf %5, %6 : vector<2x288xf32>
    %c0_6 = arith.constant 0 : index
    %c0_7 = arith.constant 0 : index
    %8 = vector.load %arg4[%c0_6, %c0_7] : memref<2x288xf32, #tpu.memory_space<vmem>>, vector<2x288xf32>
    tpu.vector_store %arg4[%c0_6, %c0_7], %7 {strides = array<i32>} : memref<2x288xf32, #tpu.memory_space<vmem>>, vector<2x288xf32>,
    return
  }
  func.func @transform_0(%arg0: i32) -> (i32, i32) {
    %c0_i32 = arith.constant 0 : i32
    %c0_i32_0 = arith.constant 0 : i32
    %c0_i32_1 = arith.constant 0 : i32
    return %c0_i32, %c0_i32_0 : i32, i32
  }
  func.func @transform_1(%arg0: i32) -> (i32, i32) {
    %c0_i32 = arith.constant 0 : i32
    %c0_i32_0 = arith.constant 0 : i32
    %c0_i32_1 = arith.constant 0 : i32
    return %c0_i32, %c0_i32_0 : i32, i32
  }
  func.func @transform_2(%arg0: i32) -> (i32, i32) {
    %c0_i32 = arith.constant 0 : i32
    %c0_i32_0 = arith.constant 0 : i32
    %c0_i32_1 = arith.constant 0 : i32
    return %c0_i32, %c0_i32_0 : i32, i32
  }
  func.func @transform_3(%arg0: i32) -> (i32, i32) {
    %c0_i32 = arith.constant 0 : i32
    %c0_i32_0 = arith.constant 0 : i32
    %c0_i32_1 = arith.constant 0 : i32
    return %c0_i32, %c0_i32_0 : i32, i32
  }
}

</mosaic_0001>

<bundles_post_ra>
// kernel: tpu_custom_call.1
= control target key start
LH: loop header
LB: loop body
LE: loop exit
PB: predicated region body
PF: predicated region fallthrough
CT: control target
= control target key end

     0   :  { %8 = vsyncpa [#allocation3], 0  ;;  %s430_s0 = inlined_call_operand.hbm [shape: f32[2,16], index: 0, kind: input, shape index: {}]   ;;  %s431_s1 = inlined_call_operand.hbm [shape: f32[16,288], index: 1, kind: input, shape index: {}]   ;;  %s432_s2 = inlined_call_operand.vmem [shape: f32[1,288], index: 2, kind: input, shape index: {}]   ;;  %s433_s3 = inlined_call_operand.hbm [shape: f32[2,288], index: 3, kind: output, shape index: {}]  }
   0x1   :  { %9 = vsyncpa [#allocation6], 0 }
   0x2   :  { %10 = vsyncpa [#allocation4], 0  ;;  %s355_s12 = smov [#allocation2]   ;;  %s356_s14 = smov [#allocation5]  }
   0x3   :  { %s17_s13 = sshll.u32 %s355_s12, 4  ;;  %s26_s15 = sshll.u32 %s356_s14, 4  ;;  %s18_s13 = int_to_ptr.vmem [resolvable:$true] %s17_s13  ;;  %s384_s15 = int_to_ptr.vmem [resolvable:$true] %s26_s15 }
   0x4   :  { %s283_s18 = scalar_lea.hbm %s430_s0, 32 }
   0x5   :  { %p284_p0 = scmp.ne.s32.totalorder %s430_s0, %s283_s18  ;;  %p287_p1 = scmp.lt.u32.totalorder %s283_s18, %s430_s0 }
   0x7   :  { %p289_p2 = pnand %p287_p1, %p284_p0 }
   0x9   :  { %292 = shalt.err (!%p289_p2)
}
   0xa   :  { %s293_s23 = scalar_lea.vmem %s18_s13, 32  ;;  %p298_p4 = scmp.lt.s32.totalorder %s18_s13, %s18_s13 }
   0xb   :  { %p294_p3 = scmp.ne.s32.totalorder %s18_s13, %s293_s23  ;;  %p299_p5 = scmp.lt.s32.totalorder %s293_s23, %s293_s23 }
   0xd   :  { %p300_p6 = por %p299_p5, %p298_p4 }
   0xf   :  { %p301_p7 = pnand %p300_p6, %p294_p3 }
  0x11   :  { %304 = shalt.err (!%p301_p7)
}
  0x12   :  { %20 = dma.hbm_to_vmem [thread:$0]  %s430_s0, 32, %s18_s13, [#allocation3]  }
  0x13   :  { %s305_s28 = scalar_lea.hbm %s431_s1, 768 }
  0x14   :  { %p306_p8 = scmp.ne.s32.totalorder %s431_s1, %s305_s28  ;;  %p309_p9 = scmp.lt.u32.totalorder %s305_s28, %s431_s1 }
  0x16   :  { %p311_p10 = pnand %p309_p9, %p306_p8 }
  0x18   :  { %314 = shalt.err (!%p311_p10)
}
  0x19   :  { %s315_s6 = scalar_lea.vmem %s384_s15, 768  ;;  %p320_p12 = scmp.lt.s32.totalorder %s384_s15, %s384_s15 }
  0x1a   :  { %p316_p11 = scmp.ne.s32.totalorder %s384_s15, %s315_s6  ;;  %p321_p13 = scmp.lt.s32.totalorder %s315_s6, %s315_s6 }
  0x1c   :  { %p322_p0 = por %p321_p13, %p320_p12 }
  0x1e   :  { %p323_p1 = pnand %p322_p0, %p316_p11 }
  0x20   :  { %326 = shalt.err (!%p323_p1)
}
  0x21   :  { %s357_s0 = smov 384   ;;  %s358_s7 = smov 24  }
  0x22   :  { %32 = dma.hbm_to_vmem [thread:$0]  %s431_s1, 768, %s384_s15, [#allocation6], %s357_s0, %s357_s0, %s358_s7  }
  0x23   :  { %349 = dma.done.wait [#allocation3], 32  }
  0x24   :  { %350 = vsyncadd [#allocation3], 4294967264 }
  0x25   :  { %351 = dma.done.wait [#allocation6], 768  }
  0x26   :  { %352 = vsyncadd [#allocation6], 4294966528  ;;  %v359_v0 = vmov 0.0|0.0   ;;  %v360_v1 = vmov 0.0   ;;  %vm361_vm0 = vmmov 0   ;;  %v43_v2 = vld [vmem:[#allocation5 + $0x8] sm:$0xff]  ;;  %v50_v12 = vlaneseq }
  0x27   :  { %271 = vmatprep.subr.bf16.mxu1 %v359_v0  ;;  %133 = vmatprep.mubr.f32.mxu0 %v360_v1  ;;  %v46_v3 = vld [vmem:[#allocation5 + $0x20] sm:$0xff]  ;;  %v45_v6 = vld [vmem:[#allocation5 + $0x18] sm:$0xff]  ;;  %v44_v7 = vld [vmem:[#allocation5 + $0x10] sm:$0xff]  ;;  %vm65_vm1 = vcmask 130048   ;;  %v362_v18 = vmov 1983009808  }
  0x28   :  { %264 = vmatprep.mubr.msk.f32.mxu1 %vm361_vm0, %v360_v1  ;;  %v42_v4 = vld [vmem:[#allocation5] sm:$0xff]  ;;  %v267_v5 = vpack.c.bf16 %v46_v3, %v43_v2  ;;  %v47_v8 = vld [vmem:[#allocation5 + $0x28] sm:$0xff]  ;;  %v41_v11 = vld [vmem:[#allocation2] sm:$0x3]  ;;  %v51_v13 = vshrl.u32 %v50_v12, 7  ;;  %v218_v19 = vunpack.c.l.s4 %v362_v18  ;;  %vm233_vm2 = vcmask 1041408  }
  0x29   :  { %v269_v9 = vpack.c.bf16 %v45_v6, %v42_v4  ;;  %v272_v10 = vpack.c.bf16 %v47_v8, %v44_v7  ;;  %v48_v16 = vld [vmem:[%s432_s2] sm:$0x7]  ;;  %vm234_vm3 = vcmask 1043458   ;;  %vm236_vm5 = vcmask 259076   ;;  %s363_s2 = smov [#allocation7]  }
  0x2a   :  { %268 = vmatprep.subr.bf16.mxu0 %v267_v5  ;;  %v52_v14 = vsub.s32 0, %v51_v13  ;;  %v60_v15 = vsub.s32 2, %v51_v13  ;;  %v56_v17 = vsub.s32 1, %v51_v13  ;;  %v219_v23 = vunpack.c.0.s8 %v218_v19  ;;  %vm235_vm4 = vmor %vm234_vm3, %vm233_vm2  ;;  %s245_s11 = sshll.u32 %s363_s2, 4  ;;  %s246_s11 = int_to_ptr.vmem [resolvable:$true] %s245_s11 }
  0x2b   :  { %270 = vmatpush1.bf16.msra.mxu0 %v269_v9  ;;  %273 = vmatpush3.bf16.msra.mxu1 %v272_v10  ;;  %vm237_vm6 = vmor %vm236_vm5, %vm235_vm4  ;;  %s327_s12 = scalar_lea.vmem %s246_s11, 96  ;;  %p332_p3 = scmp.lt.s32.totalorder %s246_s11, %s246_s11 }
  0x2c   :  { %v53_v20 = vrot.slane %v48_v16, %v52_v14  ;;  %v61_v21 = vrot.slane %v48_v16, %v60_v15  ;;  %v57_v22 = vrot.slane %v48_v16, %v56_v17  ;;  %v222_v31 = vsub.s32 %v219_v23, %v51_v13  ;;  %p328_p2 = scmp.ne.s32.totalorder %s246_s11, %s327_s12  ;;  %p333_p4 = scmp.lt.s32.totalorder %s327_s12, %s327_s12 }
  0x2e   :  { %255 = vmatmul.mubr.msk.f32.vlgmr.msra.gmra.mrb[0].mxu0 %vm65_vm1, %v41_v11  ;;  %265 = vmatmul.mubr.msk.f32.vlgmr.msra.gmra.mrb[0].mxu1 %vm65_vm1, %v41_v11  ;;  %p334_p5 = por %p333_p4, %p332_p3 }
  0x30   :  { %p335_p6 = pnand %p334_p5, %p328_p2 }
 0x101   :  { %v135_v24 = vpop.f32.mrb[0].mxu0  ;;  %v206_v25 = vpop.f32.mrb[0].mxu1 }
 0x102   :  { %v136_v26 = vadd.f32 %v135_v24, %v53_v20  ;;  %v137_v27 = vpop.f32.mrb[1].mxu0  ;;  %v207_v28 = vadd.f32 %v206_v25, %v61_v21  ;;  %v266_v29 = vpop.f32.mrb[1].mxu1 }
 0x103   :  { %v138_v30 = vadd.f32 %v137_v27, %v57_v22 }
 0x104   :  { %v210_v32 = vmax.f32 %v136_v26, 0.0  ;;  %v212_v33 = vmax.f32 %v207_v28, 0.0 }
 0x105   :  { %v211_v34 = vmax.f32 %v138_v30, 0.0 }
 0x106   :  { %v230_v36 = vrot.slane %v212_v33, %v222_v31 }
 0x107   :  { %v216_v35 = vcombine.low %v210_v32, %v211_v34 }
 0x109   :  { %v223_v37 = vrot.slane %v216_v35, %v222_v31 }
 0x10b   :  { %v231_v38 = vcombine.low %v223_v37, %v230_v36 }
 0x10d   :  { %238 = vst.msk [vmem:[#allocation7] sm:$0x3f] %vm237_vm6, %v231_v38 }
 0x10e   :  { %338 = shalt.err (!%p335_p6)
}
 0x10f   :  { %s339_s15 = scalar_lea.hbm %s433_s3, 96 }
 0x110   :  { %p340_p7 = scmp.ne.s32.totalorder %s433_s3, %s339_s15  ;;  %p343_p8 = scmp.lt.u32.totalorder %s339_s15, %s433_s3 }
 0x112   :  { %p345_p9 = pnand %p343_p8, %p340_p7 }
 0x114   :  { %348 = shalt.err (!%p345_p9)
}
 0x115   :  { %248 = dma.vmem_to_hbm [thread:$0]  %s246_s11, 96, %s433_s3, [#allocation4]  }
 0x116   :  { %353 = dma.done.wait [#allocation4], 96  }
 0x117   :  { %354 = vsyncadd [#allocation4], 4294967200 }
 0x118   :  { %252 = vsyncpa [#allocation3], 1 }
 0x119   :  { %253 = vsyncpa [#allocation6], 1 }
 0x11a   :  { %254 = vsyncpa [#allocation4], 1 }

</bundles_post_ra>
